<compile_context>
chip_gen: v7x
topology: tpu7x:2x2x1
jax: 0.10.0
libtpu: 0.0.40
codegen_flags: <defaults>
</compile_context>

<pallas_src>
import functools

import jax
import jax.numpy as jnp
from jax.experimental import pallas as pl
from jax.experimental.pallas import tpu as pltpu

STATE_SIZE = 4    # CartPole-v1 observation dim
ACTION_SIZE = 2   # CartPole-v1 action dim
HIDDEN = 64
STATE_PAD = 8     # layer-1 contraction padded to one f32 sublane
OUT_PAD = 8       # final layer padded to 8 output columns (16x less writeback than 128)


def qnetwork_kernel(x_ref, w1_ref, b1_ref, w2_ref, b2_ref, w3_ref, b3_ref, o_ref):
    """Fused 3-layer MLP: relu(x@W1+b1) -> relu(.@W2+b2) -> .@W3+b3 (W1/W3 pre-padded)."""
    # Layer 1: (tb, 8) @ (8, 64) on the MXU, f32 accumulation.
    h1 = jnp.maximum(
        jnp.dot(x_ref[...], w1_ref[...], preferred_element_type=jnp.float32) + b1_ref[...],
        0.0)
    # Layer 2: (tb, 64) @ (64, 64).
    h2 = jnp.maximum(
        jnp.dot(h1, w2_ref[...], preferred_element_type=jnp.float32) + b2_ref[...],
        0.0)
    # Layer 3: (tb, 64) @ (64, 8); only the first ACTION_SIZE columns are real.
    o_ref[...] = (jnp.dot(h2, w3_ref[...], preferred_element_type=jnp.float32)
                  + b3_ref[...]).astype(o_ref.dtype)


def _round_up(n, m):
    return ((n + m - 1) // m) * m


def prepare_params(params):
    """One-time prep: cast to f32 and zero-pad W1 (K: 4->8) and W3/b3 (N: 2->8)."""
    w1, b1, w2, b2, w3, b3 = params
    w1p = jnp.zeros((STATE_PAD, HIDDEN), jnp.float32).at[:STATE_SIZE, :].set(
        w1.astype(jnp.float32))
    b1p = b1.astype(jnp.float32).reshape(1, HIDDEN)
    w2p = w2.astype(jnp.float32)
    b2p = b2.astype(jnp.float32).reshape(1, HIDDEN)
    w3p = jnp.zeros((HIDDEN, OUT_PAD), jnp.float32).at[:, :ACTION_SIZE].set(
        w3.astype(jnp.float32))
    b3p = jnp.zeros((1, OUT_PAD), jnp.float32).at[:, :ACTION_SIZE].set(
        b3.astype(jnp.float32).reshape(1, ACTION_SIZE))
    return (w1p, b1p, w2p, b2p, w3p, b3p)


@functools.partial(jax.jit, static_argnames=("block_batch",))
def qnetwork_forward(x, prepared_params, *, block_batch=2048):
    """x: [B, STATE_SIZE] float32 -> [B, ACTION_SIZE] float32."""
    w1p, b1p, w2p, b2p, w3p, b3p = prepared_params
    B = x.shape[0]

    # Grid-step count: as few steps as possible (single-TC v5e/v6e), but keep it even and
    # >= 2 for mid/large batches so v7x's two TensorCores both get work.
    n_steps = max(1, -(-B // block_batch))
    if n_steps == 1 and B >= 256:
        n_steps = 2
    elif n_steps > 1 and n_steps % 2 == 1:
        n_steps += 1
    tb = _round_up(-(-B // n_steps), 8)       # row tile, caps padding waste at one sublane
    b_pad = _round_up(B, tb)
    grid = (b_pad // tb,)

    # Single pad op: batch rows to a tile multiple + feature dim 4 -> 8 (zeros).
    x = jnp.pad(x.astype(jnp.float32),
                ((0, b_pad - B), (0, STATE_PAD - STATE_SIZE)))

    reuse = lambda i: (0, 0)   # weights/biases: same block every grid step (no re-DMA)

    out_padded = pl.pallas_call(
        qnetwork_kernel,
        out_shape=jax.ShapeDtypeStruct((b_pad, OUT_PAD), jnp.float32),
        grid=grid,
        in_specs=[
            pl.BlockSpec((tb, STATE_PAD), lambda i: (i, 0)),    # x tile
            pl.BlockSpec((STATE_PAD, HIDDEN), reuse),           # W1 (K-padded)
            pl.BlockSpec((1, HIDDEN), reuse),                   # b1
            pl.BlockSpec((HIDDEN, HIDDEN), reuse),              # W2
            pl.BlockSpec((1, HIDDEN), reuse),                   # b2
            pl.BlockSpec((HIDDEN, OUT_PAD), reuse),             # W3 (N-padded)
            pl.BlockSpec((1, OUT_PAD), reuse),                  # b3 (N-padded)
        ],
        out_specs=pl.BlockSpec((tb, OUT_PAD), lambda i: (i, 0)),
        compiler_params=pltpu.CompilerParams(
            dimension_semantics=("parallel",)),
    )(x, w1p, b1p, w2p, b2p, w3p, b3p)

    # Drop batch padding and the padded Q-columns (cheap: slab is only OUT_PAD wide now).
    return out_padded[:B, :ACTION_SIZE]


def init_params(key):
    """Deterministic init matching nn.Linear shapes (stored as [in, out])."""
    k1, k2, k3, k4, k5, k6 = jax.random.split(key, 6)

    def uniform_linear(kw, kb, fan_in, fan_out):
        # mimic PyTorch default: U(-1/sqrt(fan_in), 1/sqrt(fan_in))
        bound = 1.0 / jnp.sqrt(jnp.float32(fan_in))
        w = jax.random.uniform(kw, (fan_in, fan_out), jnp.float32, -bound, bound)
        b = jax.random.uniform(kb, (1, fan_out), jnp.float32, -bound, bound)
        return w, b

    w1, b1 = uniform_linear(k1, k2, STATE_SIZE, HIDDEN)
    w2, b2 = uniform_linear(k3, k4, HIDDEN, HIDDEN)
    w3, b3 = uniform_linear(k5, k6, HIDDEN, ACTION_SIZE)
    return (w1, b1, w2, b2, w3, b3)


def reference_forward(x, params):
    w1, b1, w2, b2, w3, b3 = params
    h1 = jnp.maximum(x @ w1 + b1, 0.0)
    h2 = jnp.maximum(h1 @ w2 + b2, 0.0)
    return h2 @ w3 + b3


if __name__ == "__main__":
    key = jax.random.PRNGKey(0)
    kp, kx1, kx2 = jax.random.split(key, 3)
    params = init_params(kp)
    prepared = prepare_params(params)   # one-time weight padding/cast

    # Small-batch case (RL action-selection path): tb=8, grid=(1,).
    batch = 2
    x_small = jax.random.normal(kx1, (batch, STATE_SIZE), jnp.float32)
    out_small = jax.block_until_ready(qnetwork_forward(x_small, prepared))
    ref_small = reference_forward(x_small, params)
    assert out_small.shape == (batch, ACTION_SIZE)
    assert jnp.allclose(out_small, ref_small, atol=1e-4, rtol=1e-4)

    # Larger, non-tile-multiple batch: exercises the even 2-step grid (v7x balance) +
    # batch padding path (B=1000 -> tb=504, b_pad=1008).
    big = 1000
    x_big = jax.random.normal(kx2, (big, STATE_SIZE), jnp.float32)
    out_big = jax.block_until_ready(qnetwork_forward(x_big, prepared))
    ref_big = reference_forward(x_big, params)
    assert out_big.shape == (big, ACTION_SIZE)
    assert jnp.allclose(out_big, ref_big, atol=1e-4, rtol=1e-4)

    print("KERNEL_OK")
</pallas_src>

<mosaic_0001>
module attributes {stable_mosaic.version = 11 : i64} {
  func.func @qnetwork_kernel(%arg0: i32, %arg1: memref<8x8xf32, #tpu.memory_space<vmem>>, %arg2: memref<8x64xf32, #tpu.memory_space<vmem>>, %arg3: memref<1x64xf32, #tpu.memory_space<vmem>>, %arg4: memref<64x64xf32, #tpu.memory_space<vmem>>, %arg5: memref<1x64xf32, #tpu.memory_space<vmem>>, %arg6: memref<64x8xf32, #tpu.memory_space<vmem>>, %arg7: memref<1x8xf32, #tpu.memory_space<vmem>>, %arg8: memref<8x8xf32, #tpu.memory_space<vmem>>) attributes {dimension_semantics = [#tpu.dimension_semantics<parallel>], iteration_bounds = array<i64: 1>, scalar_prefetch = 0 : i64, scratch_operands = 0 : i64, tpu.core_type = #tpu.core_type<tc>, window_params = [{transform_indices = @transform_0, window_bounds = array<i64: 8, 8>}, {pipeline_mode = #tpu.pipeline_mode<synchronous>, transform_indices = @transform_1, window_bounds = array<i64: 8, 64>}, {pipeline_mode = #tpu.pipeline_mode<synchronous>, transform_indices = @transform_2, window_bounds = array<i64: 1, 64>}, {pipeline_mode = #tpu.pipeline_mode<synchronous>, transform_indices = @transform_3, window_bounds = array<i64: 64, 64>}, {pipeline_mode = #tpu.pipeline_mode<synchronous>, transform_indices = @transform_4, window_bounds = array<i64: 1, 64>}, {pipeline_mode = #tpu.pipeline_mode<synchronous>, transform_indices = @transform_5, window_bounds = array<i64: 64, 8>}, {pipeline_mode = #tpu.pipeline_mode<synchronous>, transform_indices = @transform_6, window_bounds = array<i64: 1, 8>}, {transform_indices = @transform_7, window_bounds = array<i64: 8, 8>}]} {
    %c0 = arith.constant 0 : index
    %c0_0 = arith.constant 0 : index
    %0 = vector.load %arg1[%c0, %c0_0] : memref<8x8xf32, #tpu.memory_space<vmem>>, vector<8x8xf32>
    %c0_1 = arith.constant 0 : index
    %c0_2 = arith.constant 0 : index
    %1 = vector.load %arg2[%c0_1, %c0_2] : memref<8x64xf32, #tpu.memory_space<vmem>>, vector<8x64xf32>
    %cst = arith.constant dense<0.000000e+00> : vector<8x64xf32>
    %2 = tpu.matmul %0, %1, %cst {dimension_numbers = #tpu.dot_dimension_numbers<[1], [0], [0], [1], [0, 0, 1, 1], [], []>} : vector<8x8xf32>, vector<8x64xf32>, vector<8x64xf32> -> vector<8x64xf32>
    %c0_3 = arith.constant 0 : index
    %c0_4 = arith.constant 0 : index
    %3 = vector.load %arg3[%c0_3, %c0_4] : memref<1x64xf32, #tpu.memory_space<vmem>>, vector<1x64xf32>
    %4 = vector.broadcast %3 : vector<1x64xf32> to vector<8x64xf32>
    %5 = arith.addf %2, %4 : vector<8x64xf32>
    %cst_5 = arith.constant 0.000000e+00 : f32
    %6 = vector.broadcast %cst_5 : f32 to vector<8x64xf32>
    %7 = arith.maximumf %5, %6 : vector<8x64xf32>
    %c0_6 = arith.constant 0 : index
    %c0_7 = arith.constant 0 : index
    %8 = vector.load %arg4[%c0_6, %c0_7] : memref<64x64xf32, #tpu.memory_space<vmem>>, vector<64x64xf32>
    %cst_8 = arith.constant dense<0.000000e+00> : vector<8x64xf32>
    %9 = tpu.matmul %7, %8, %cst_8 {dimension_numbers = #tpu.dot_dimension_numbers<[1], [0], [0], [1], [0, 0, 1, 1], [], []>} : vector<8x64xf32>, vector<64x64xf32>, vector<8x64xf32> -> vector<8x64xf32>
    %c0_9 = arith.constant 0 : index
    %c0_10 = arith.constant 0 : index
    %10 = vector.load %arg5[%c0_9, %c0_10] : memref<1x64xf32, #tpu.memory_space<vmem>>, vector<1x64xf32>
    %11 = vector.broadcast %10 : vector<1x64xf32> to vector<8x64xf32>
    %12 = arith.addf %9, %11 : vector<8x64xf32>
    %cst_11 = arith.constant 0.000000e+00 : f32
    %13 = vector.broadcast %cst_11 : f32 to vector<8x64xf32>
    %14 = arith.maximumf %12, %13 : vector<8x64xf32>
    %c0_12 = arith.constant 0 : index
    %c0_13 = arith.constant 0 : index
    %15 = vector.load %arg6[%c0_12, %c0_13] : memref<64x8xf32, #tpu.memory_space<vmem>>, vector<64x8xf32>
    %cst_14 = arith.constant dense<0.000000e+00> : vector<8x8xf32>
    %16 = tpu.matmul %14, %15, %cst_14 {dimension_numbers = #tpu.dot_dimension_numbers<[1], [0], [0], [1], [0, 0, 1, 1], [], []>} : vector<8x64xf32>, vector<64x8xf32>, vector<8x8xf32> -> vector<8x8xf32>
    %c0_15 = arith.constant 0 : index
    %c0_16 = arith.constant 0 : index
    %17 = vector.load %arg7[%c0_15, %c0_16] : memref<1x8xf32, #tpu.memory_space<vmem>>, vector<1x8xf32>
    %18 = vector.broadcast %17 : vector<1x8xf32> to vector<8x8xf32>
    %19 = arith.addf %16, %18 : vector<8x8xf32>
    %c0_17 = arith.constant 0 : index
    %c0_18 = arith.constant 0 : index
    %20 = vector.load %arg8[%c0_17, %c0_18] : memref<8x8xf32, #tpu.memory_space<vmem>>, vector<8x8xf32>
    tpu.vector_store %arg8[%c0_17, %c0_18], %19 {strides = array<i32>} : memref<8x8xf32, #tpu.memory_space<vmem>>, vector<8x8xf32>,
    return
  }
  func.func @transform_0(%arg0: i32) -> (i32, i32) {
    %c0_i32 = arith.constant 0 : i32
    %c0_i32_0 = arith.constant 0 : i32
    return %arg0, %c0_i32 : i32, i32
  }
  func.func @transform_1(%arg0: i32) -> (i32, i32) {
    %c0_i32 = arith.constant 0 : i32
    %c0_i32_0 = arith.constant 0 : i32
    %c0_i32_1 = arith.constant 0 : i32
    return %c0_i32, %c0_i32_0 : i32, i32
  }
  func.func @transform_2(%arg0: i32) -> (i32, i32) {
    %c0_i32 = arith.constant 0 : i32
    %c0_i32_0 = arith.constant 0 : i32
    %c0_i32_1 = arith.constant 0 : i32
    return %c0_i32, %c0_i32_0 : i32, i32
  }
  func.func @transform_3(%arg0: i32) -> (i32, i32) {
    %c0_i32 = arith.constant 0 : i32
    %c0_i32_0 = arith.constant 0 : i32
    %c0_i32_1 = arith.constant 0 : i32
    return %c0_i32, %c0_i32_0 : i32, i32
  }
  func.func @transform_4(%arg0: i32) -> (i32, i32) {
    %c0_i32 = arith.constant 0 : i32
    %c0_i32_0 = arith.constant 0 : i32
    %c0_i32_1 = arith.constant 0 : i32
    return %c0_i32, %c0_i32_0 : i32, i32
  }
  func.func @transform_5(%arg0: i32) -> (i32, i32) {
    %c0_i32 = arith.constant 0 : i32
    %c0_i32_0 = arith.constant 0 : i32
    %c0_i32_1 = arith.constant 0 : i32
    return %c0_i32, %c0_i32_0 : i32, i32
  }
  func.func @transform_6(%arg0: i32) -> (i32, i32) {
    %c0_i32 = arith.constant 0 : i32
    %c0_i32_0 = arith.constant 0 : i32
    %c0_i32_1 = arith.constant 0 : i32
    return %c0_i32, %c0_i32_0 : i32, i32
  }
  func.func @transform_7(%arg0: i32) -> (i32, i32) {
    %c0_i32 = arith.constant 0 : i32
    %c0_i32_0 = arith.constant 0 : i32
    return %arg0, %c0_i32 : i32, i32
  }
}

</mosaic_0001>

<bundles_post_ra>
// kernel: qnetwork_forward.1
= control target key start
LH: loop header
LB: loop body
LE: loop exit
PB: predicated region body
PF: predicated region fallthrough
CT: control target
= control target key end

     0   :  { %vm35_vm0 = vcmask 64512   ;;  %v389_v0 = vmov 0.0   ;;  %vm390_vm1 = vmmov 0   ;;  %v391_v4 = vmov 0.0|0.0   ;;  %s500_s1 = inlined_call_operand.vmem [shape: f32[8,64], index: 1, kind: input, shape index: {}]   ;;  %s501_s0 = inlined_call_operand.vmem [shape: f32[8,8], index: 0, kind: input, shape index: {}]   ;;  %s502_s3 = inlined_call_operand.vmem [shape: f32[64,64], index: 3, kind: input, shape index: {}]   ;;  %s503_s5 = inlined_call_operand.vmem [shape: f32[64,8], index: 5, kind: input, shape index: {}]   ;;  %s504_s2 = inlined_call_operand.vmem [shape: f32[1,64], index: 2, kind: input, shape index: {}]   ;;  %s505_s4 = inlined_call_operand.vmem [shape: f32[1,64], index: 4, kind: input, shape index: {}]   ;;  %s506_s6 = inlined_call_operand.vmem [shape: f32[1,8], index: 6, kind: input, shape index: {}]   ;;  %s507_s7 = inlined_call_operand.vmem [shape: f32[8,8], index: 7, kind: output, shape index: {}]  }
   0x1   :  { %319 = vmatprep.subr.mxu0 %v389_v0  ;;  %v27_v1 = vld [vmem:[%s500_s1] sm:$0xff]  ;;  %321 = vmatprep.mubr.msk.f32.mxu0 %vm390_vm1, %v389_v0  ;;  %v111_v5 = vld [vmem:[%s502_s3 + $0x8] sm:$0xff]  ;;  %v112_v6 = vld [vmem:[%s502_s3 + $0x10] sm:$0xff]  ;;  %vm125_vm2 = vcmask 523264  }
   0x2   :  { %v26_v2 = vld [vmem:[%s501_s0] sm:$0xff]  ;;  %320 = vmatpush3.msra.mxu0 %v27_v1  ;;  %362 = vmatprep.subr.bf16.mxu1 %v391_v4  ;;  %v113_v7 = vld [vmem:[%s502_s3 + $0x18] sm:$0xff]  ;;  %v115_v11 = vld [vmem:[%s502_s3 + $0x28] sm:$0xff] }
   0x3   :  { %v110_v3 = vld [vmem:[%s502_s3] sm:$0xff]  ;;  %322 = vmatmul.mubr.msk.f32.vlgmr.msra.gmra.mrb[0].mxu0 %vm35_vm0, %v26_v2  ;;  %340 = vmatprep.mubr.msk.f32.mxu1 %vm390_vm1, %v389_v0  ;;  %v366_v9 = vpack.c.bf16 %v113_v7, %v112_v6  ;;  %v116_v13 = vld [vmem:[%s502_s3 + $0x30] sm:$0xff]  ;;  %v117_v14 = vld [vmem:[%s502_s3 + $0x38] sm:$0xff] }
   0x4   :  { %v363_v8 = vpack.c.bf16 %v111_v5, %v110_v3  ;;  %374 = vmatprep.subr.bf16.mxu0 %v391_v4  ;;  %359 = vmatprep.mubr.msk.f32.mxu0 %vm390_vm1, %v389_v0  ;;  %v114_v10 = vld [vmem:[%s502_s3 + $0x20] sm:$0xff]  ;;  %v372_v15 = vpack.c.bf16 %v117_v14, %v116_v13  ;;  %v201_v17 = vld [vmem:[%s503_s5 + $0x8] sm:$0xff]  ;;  %v202_v18 = vld [vmem:[%s503_s5 + $0x10] sm:$0xff] }
   0x5   :  { %v369_v12 = vpack.c.bf16 %v115_v11, %v114_v10  ;;  %v200_v16 = vld [vmem:[%s503_s5] sm:$0xff]  ;;  %v203_v20 = vld [vmem:[%s503_s5 + $0x18] sm:$0xff]  ;;  %v205_v23 = vld [vmem:[%s503_s5 + $0x28] sm:$0xff] }
   0x6   :  { %364 = vmatpush3.bf16.msra.mxu1 %v363_v8  ;;  %v375_v19 = vpack.c.bf16 %v201_v17, %v200_v16  ;;  %v378_v21 = vpack.c.bf16 %v203_v20, %v202_v18  ;;  %v204_v22 = vld [vmem:[%s503_s5 + $0x20] sm:$0xff]  ;;  %v206_v30 = vld [vmem:[%s503_s5 + $0x30] sm:$0xff]  ;;  %v207_v31 = vld [vmem:[%s503_s5 + $0x38] sm:$0xff] }
   0x7   :  { %365 = vmatprep.subr.bf16.mxu1 %v391_v4  ;;  %v381_v24 = vpack.c.bf16 %v205_v23, %v204_v22  ;;  %v293_v25 = vld [vmem:[%s504_s2] ss:$0 sm:$0xff]  ;;  %v384_v32 = vpack.c.bf16 %v207_v31, %v206_v30 }
   0x8   :  { %376 = vmatpush3.bf16.msra.mxu0 %v375_v19  ;;  %v295_v33 = vld [vmem:[%s505_s4] ss:$0 sm:$0xff] }
   0x9   :  { %377 = vmatprep.subr.bf16.mxu0 %v391_v4  ;;  %v297_v38 = vld [vmem:[%s506_s6] ss:$0 sm:$0xff] }
   0xa   :  { %367 = vmatpush3.bf16.msra.mxu1 %v366_v9 }
   0xb   :  { %368 = vmatprep.subr.bf16.mxu1 %v391_v4 }
   0xc   :  { %379 = vmatpush3.bf16.msra.mxu0 %v378_v21 }
   0xd   :  { %380 = vmatprep.subr.bf16.mxu0 %v391_v4 }
   0xe   :  { %370 = vmatpush3.bf16.msra.mxu1 %v369_v12 }
   0xf   :  { %371 = vmatprep.subr.bf16.mxu1 %v391_v4 }
  0x10   :  { %382 = vmatpush3.bf16.msra.mxu0 %v381_v24 }
  0x11   :  { %383 = vmatprep.subr.bf16.mxu0 %v391_v4 }
  0x12   :  { %373 = vmatpush3.bf16.msra.mxu1 %v372_v15 }
  0x14   :  { %385 = vmatpush3.bf16.msra.mxu0 %v384_v32 }
  0xd6   :  { %v105_v26 = vpop.f32.mrb[0].mxu0 }
  0xd7   :  { %v106_v27 = vadd.f32 %v293_v25, %v105_v26  ;;  %v323_v28 = vpop.f32.mrb[1].mxu0 }
  0xd9   :  { %v109_v29 = vmax.f32 %v106_v27, 0.0 }
  0xdb   :  { %341 = vmatmul.mubr.msk.f32.vlgmr.msra.gmra.mrb[0].mxu1 %vm125_vm2, %v109_v29 }
 0x1ae   :  { %v195_v34 = vpop.f32.mrb[0].mxu1 }
 0x1af   :  { %v196_v35 = vadd.f32 %v295_v33, %v195_v34  ;;  %v342_v36 = vpop.f32.mrb[1].mxu1 }
 0x1b1   :  { %v199_v37 = vmax.f32 %v196_v35, 0.0 }
 0x1b3   :  { %360 = vmatmul.mubr.msk.f32.vlgmr.msra.gmra.mrb[2].mxu0 %vm125_vm2, %v199_v37 }
 0x286   :  { %v284_v39 = vpop.f32.mrb[2].mxu0 }
 0x287   :  { %v285_v40 = vadd.f32 %v297_v38, %v284_v39  ;;  %v361_v41 = vpop.f32.mrb[3].mxu0 }
 0x289   :  { %288 = vst.msk [vmem:[%s507_s7] sm:$0xff] %vm35_vm0, %v285_v40 }

</bundles_post_ra>
